<compile_context>
chip_gen: v7x
topology: tpu7x:2x2x1
jax: 0.10.0
libtpu: 0.0.40
codegen_flags: <defaults>
</compile_context>

<pallas_src>
import functools

import jax
import jax.numpy as jnp
from jax import lax
from jax.experimental import pallas as pl
from jax.experimental.pallas import tpu as pltpu

_NEG_BIG = -1.0e30   # finite "-inf" for masking padded classes


def _softmax(x, axis, approx):
    """Numerically-stable softmax; optional approx (EUP) reciprocal."""
    m = jnp.max(x, axis=axis, keepdims=True)
    e = jnp.exp(x - m)
    s = jnp.sum(e, axis=axis, keepdims=True)
    if approx:
        return e * pl.reciprocal(s, approx=True)
    return e / s


def _calip_kernel(fs_ref, ft_ref, ftt_ref, fv_ref, out_ref, *,
                  alpha_t, alpha_s, beta_1, beta_2, beta_3, logit_scale,
                  c_valid, approx_recip):
    # fs_ref: (Bb, M, D)  ft_ref: (C, D)  ftt_ref: (D, C)
    # fv_ref: (Bb, Nv, D) out_ref: (Bb, Nv, C);  C is the lane-padded count.
    Bb, M, D = fs_ref.shape
    C = ft_ref.shape[0]
    Nv = fv_ref.shape[1]
    cdt = ft_ref.dtype                      # MXU operand (compute) dtype

    ft = ft_ref[...]                        # (C, D)
    ftt = ftt_ref[...]                      # (D, C)  pre-transposed resident
    fv = fv_ref[...]                        # (Bb, Nv, D)
    fs = fs_ref[...]                        # (Bb, M, D) unnormalized

    # Inverse L2 norm of the Fs rows (f32 math, rsqrt on the EUP).  Applied by
    # post-scaling A and w; no normalized f32 copy of Fs is kept live.
    sumsq = jnp.sum(jnp.square(fs.astype(jnp.float32)), axis=-1, keepdims=True)
    inv_norm = lax.rsqrt(sumsq)             # (Bb, M, 1) f32

    # A = norm(Fs) @ Ft^T  ==  (Fs @ Ft_T) * inv_norm.
    A = jnp.dot(fs.reshape(Bb * M, D), ftt,
                preferred_element_type=jnp.float32).reshape(Bb, M, C)
    A = A * inv_norm                        # (Bb, M, C) f32

    # Lane-padded (non-existent) class mask.
    valid = None
    if c_valid < C:
        valid = lax.broadcasted_iota(jnp.int32, (1, 1, C), 2) < c_valid

    if alpha_s == alpha_t:
        # Shared exp stream: softmax is invariant to a per-batch constant
        # shift, so a single exp(z - gmax) serves both softmax axes.  CALIP's
        # cosine-bounded similarities keep |z - gmax| small (no under/overflow).
        z = A * (1.0 / alpha_s)
        gmax = jnp.max(jnp.max(z, axis=2, keepdims=True), axis=1, keepdims=True)
        e = jnp.exp(z - gmax)                                     # (Bb, M, C)
        ps_num = e if valid is None else jnp.where(valid, e, 0.0)
        ps_den = jnp.sum(ps_num, axis=2, keepdims=True)
        st_den = jnp.sum(e, axis=1, keepdims=True)
        if approx_recip:
            Ps = ps_num * pl.reciprocal(ps_den, approx=True)
            St = e * pl.reciprocal(st_den, approx=True)
        else:
            Ps = ps_num / ps_den
            St = e / st_den
    else:
        zs = A * (1.0 / alpha_s)
        if valid is not None:
            zs = jnp.where(valid, zs, _NEG_BIG)
        Ps = _softmax(zs, axis=-1, approx=approx_recip)            # over classes
        St = _softmax(A * (1.0 / alpha_t), axis=1, approx=approx_recip)  # over M

    # Fsa = softmax(A/alpha_s, C) @ Ft ;  Fva = avg-pool + max-pool over M.
    Fsa = jnp.dot(Ps.reshape(Bb * M, C).astype(cdt), ft,
                  preferred_element_type=jnp.float32).reshape(Bb, M, D)
    Fva = jnp.mean(Fsa, axis=1) + jnp.max(Fsa, axis=1)             # (Bb, D) f32

    # beta_2 term without materializing Fta:
    #   Fv @ Fta^T == (Fv @ norm(Fs)^T) @ softmax(A/alpha_t, axis=M)
    if Nv == 1:
        # VPU path: keeps the MXU pipeline for the two big (Bb*M)xDxC dots.
        w = jnp.sum((fv * fs).astype(jnp.float32), axis=-1)        # (Bb, M)
        w = w * inv_norm[:, :, 0]
        # Reduction over M stays in f32 for accuracy (St rows sum to 1).
        res2 = jnp.sum(w[:, :, None] * St, axis=1)                 # (Bb, C)
        res2 = res2[:, None, :]                                    # (Bb, 1, C)
    else:
        w = jnp.einsum('bnd,bmd->bnm', fv, fs,
                       preferred_element_type=jnp.float32)         # (Bb, Nv, M)
        w = w * inv_norm[:, :, 0][:, None, :]
        res2 = jnp.einsum('bnm,bmc->bnc', w.astype(cdt), St.astype(cdt),
                          preferred_element_type=jnp.float32)      # (Bb, Nv, C)

    # beta_1 / beta_3 logit matmuls fused into one MXU dot (linearity).
    combined = beta_1 * fv.astype(jnp.float32) + beta_3 * Fva[:, None, :]
    res13 = jnp.dot(combined.reshape(Bb * Nv, D).astype(cdt), ftt,
                    preferred_element_type=jnp.float32).reshape(Bb, Nv, C)

    out_ref[...] = (logit_scale * (res13 + beta_2 * res2)).astype(out_ref.dtype)


def _tpu_vmem_plan():
    """Generation-aware (block_picker_budget, vmem_limit_bytes,
    min_grid_steps, target_rows_per_step)."""
    kind = ""
    try:
        kind = jax.devices()[0].device_kind.lower()
    except Exception:
        pass
    vmem_cap = None
    try:
        vmem_cap = int(pltpu.get_tpu_info().vmem_capacity_bytes)
    except Exception:
        vmem_cap = None
    if vmem_cap is None:
        vmem_cap = (64 << 20) if ("v7" in kind or "7x" in kind) else (128 << 20)
    dual_tc = ("v7" in kind) or ("7x" in kind) or vmem_cap <= (64 << 20)
    if dual_tc:
        # v7x: 64 MiB part, 2 TensorCores -> keep >= 4 grid steps if possible.
        budget, limit = 36 << 20, 52 << 20
        min_steps, row_target = 4, 1024
    else:
        # v5e / v6e: 128 MiB part, single TC -> fewer, larger steps.
        budget, limit = 56 << 20, 88 << 20
        min_steps, row_target = 1, 2048
    limit = min(limit, vmem_cap - (8 << 20))
    return budget, limit, min_steps, row_target


def _pick_block_b(B, M, D, C, Nv, itemsize, budget, min_steps, row_target):
    """Largest batch-block that (a) fits a conservative VMEM model inside
    `budget`, (b) gives ~`row_target` MXU rows per step, and (c) leaves at
    least `min_steps` grid steps (dual-TC parts) when the batch allows."""
    def vmem_bytes(bb):
        inp = 2 * bb * (M + Nv) * D * itemsize        # Fs, Fv (double-buffered)
        res = 2 * 2 * C * D * itemsize                # Ft + Ft_T (2 buffers each)
        out = 2 * bb * Nv * C * 4                     # f32 logits
        f32_mc = 4 * bb * M * C * 4                   # A / exp / Ps / St temporaries
        f32_md = bb * M * D * 4                       # Fsa
        cdt_mc = bb * M * C * itemsize                # Ps recast for the MXU
        return int(1.25 * (inp + res + out + f32_mc + f32_md + cdt_mc))

    bb_fit = 1
    for bb in range(1, B + 1):
        if vmem_bytes(bb) <= budget:
            bb_fit = bb
        else:
            break
    bb = min(bb_fit, max(1, -(-row_target // M)))     # ~row_target rows / step
    if min_steps > 1 and B >= min_steps:
        bb = min(bb, max(1, B // min_steps))          # keep both v7x TCs busy
    return max(1, min(bb, B))


def calip_pf_block(Fs, Ft, Fv, *, alpha_t, alpha_s, beta_1, beta_2, beta_3,
                   compute_dtype=jnp.bfloat16, block_b=None):
    """Pallas implementation of CALIP_PF_Block.forward (returns f32 logits)."""
    logit_scale = 1.0 / 0.07                 # exp(log(1/0.07)), non-trainable

    if Fv.ndim == 2:                         # (B, D) -> (B, 1, D)
        Fv = Fv[:, None, :]
    B, M, D = Fs.shape
    C, _ = Ft.shape
    Nv = Fv.shape[1]

    cdt = jnp.dtype(compute_dtype)
    approx_recip = cdt != jnp.dtype(jnp.float32)

    # Lane-pad the class axis: dense stores / whole MXU tiles for A, Ps, St
    # and the output; padded classes are masked inside the kernel.
    C_pad = max(128, -(-C // 128) * 128)
    Ft_p = Ft.astype(cdt)
    if C_pad != C:
        Ft_p = jnp.pad(Ft_p, ((0, C_pad - C), (0, 0)))
    Ft_T = Ft_p.T                            # (D, C_pad), built once on host side

    budget, vmem_limit, min_steps, row_target = _tpu_vmem_plan()
    if block_b is None:
        block_b = _pick_block_b(B, M, D, C_pad, Nv, cdt.itemsize,
                                budget, min_steps, row_target)
    block_b = max(1, min(int(block_b), B))

    # Batch does not need to divide block_b: edge-pad up to a multiple.
    B_pad = -(-B // block_b) * block_b
    Fs_p = Fs.astype(cdt)
    Fv_p = Fv.astype(cdt)
    if B_pad != B:
        Fs_p = jnp.pad(Fs_p, ((0, B_pad - B), (0, 0), (0, 0)), mode="edge")
        Fv_p = jnp.pad(Fv_p, ((0, B_pad - B), (0, 0), (0, 0)), mode="edge")
    grid = (B_pad // block_b,)

    kernel = functools.partial(
        _calip_kernel,
        alpha_t=float(alpha_t), alpha_s=float(alpha_s),
        beta_1=float(beta_1), beta_2=float(beta_2), beta_3=float(beta_3),
        logit_scale=float(logit_scale),
        c_valid=int(C), approx_recip=approx_recip)

    shared_exp = float(alpha_s) == float(alpha_t)
    flops = 2 * B_pad * (2 * M * C_pad * D + Nv * M * D + Nv * M * C_pad
                         + Nv * D * C_pad)
    transcendentals = B_pad * M * C_pad * (1 if shared_exp else 2) + B_pad * M
    bytes_accessed = ((B_pad * (M + Nv) * D + 2 * C_pad * D) * cdt.itemsize
                      + B_pad * Nv * C_pad * 4)

    out = pl.pallas_call(
        kernel,
        out_shape=jax.ShapeDtypeStruct((B_pad, Nv, C_pad), jnp.float32),
        grid_spec=pltpu.PrefetchScalarGridSpec(
            num_scalar_prefetch=0,
            grid=grid,
            in_specs=[
                pl.BlockSpec((block_b, M, D), lambda b: (b, 0, 0)),    # Fs tile
                pl.BlockSpec((C_pad, D), lambda b: (0, 0)),            # Ft resident
                pl.BlockSpec((D, C_pad), lambda b: (0, 0)),            # Ft^T resident
                pl.BlockSpec((block_b, Nv, D), lambda b: (b, 0, 0)),   # Fv tile
            ],
            out_specs=pl.BlockSpec((block_b, Nv, C_pad), lambda b: (b, 0, 0)),
        ),
        compiler_params=pltpu.CompilerParams(
            dimension_semantics=("parallel",),
            vmem_limit_bytes=int(vmem_limit)),
        cost_estimate=pl.CostEstimate(
            flops=flops, transcendentals=transcendentals,
            bytes_accessed=bytes_accessed),
    )(Fs_p, Ft_p, Ft_T, Fv_p)

    return out[:B, :, :C]


def _reference(Fs, Ft, Fv, *, alpha_t, alpha_s, beta_1, beta_2, beta_3):
    """Pure-JAX reference mirroring the PyTorch forward (for self-check)."""
    logit_scale = jnp.exp(jnp.log(jnp.asarray(1.0 / 0.07)))
    if Fv.ndim == 2:
        Fv = Fv[:, None, :]
    with jax.default_matmul_precision("highest"):
        Ftb = jnp.broadcast_to(Ft[None], (Fv.shape[0],) + Ft.shape)
        Fs = Fs / jnp.linalg.norm(Fs, axis=-1, keepdims=True)
        A = Fs @ jnp.swapaxes(Ftb, 1, 2)
        Fsa = jax.nn.softmax(A / alpha_s, axis=-1) @ Ftb
        Fta = jax.nn.softmax(jnp.swapaxes(A, 1, 2) / alpha_t, axis=-1) @ Fs
        Fva = (jnp.mean(Fsa, axis=1, keepdims=True)
               + jnp.max(Fsa, axis=1, keepdims=True))
        res = beta_1 * logit_scale * Fv @ jnp.swapaxes(Ftb, 1, 2)
        res = res + beta_2 * logit_scale * Fv @ jnp.swapaxes(Fta, 1, 2)
        res = res + beta_3 * logit_scale * Fva @ jnp.swapaxes(Ftb, 1, 2)
    return res


if __name__ == "__main__":
    # Small, module-consistent shapes: batch=2, spatial tokens M=16,
    # classes C=8, feature dim D=32.
    B, M, C, D = 2, 16, 8, 32
    key = jax.random.PRNGKey(0)
    k1, k2, k3 = jax.random.split(key, 3)
    Fs = jax.random.normal(k1, (B, M, D), dtype=jnp.float32)
    Ft = jax.random.normal(k2, (C, D), dtype=jnp.float32)
    Ft = Ft / jnp.linalg.norm(Ft, axis=-1, keepdims=True)   # CLIP text feats unit-norm
    Fv = jax.random.normal(k3, (B, D), dtype=jnp.float32)
    Fv = Fv / jnp.linalg.norm(Fv, axis=-1, keepdims=True)

    hparams = dict(alpha_t=0.5, alpha_s=0.5, beta_1=1.0, beta_2=0.5, beta_3=0.5)
    ref = _reference(Fs, Ft, Fv, **hparams)

    # 1) f32 compute path, shared-exp (alpha_s == alpha_t) branch, exact recip.
    out32 = jax.block_until_ready(
        calip_pf_block(Fs, Ft, Fv, compute_dtype=jnp.float32, **hparams))
    assert out32.shape == (B, 1, C), out32.shape
    assert jnp.allclose(out32, ref, atol=2e-2, rtol=2e-2), (
        f"f32 max abs err {jnp.max(jnp.abs(out32 - ref))}")

    # 2) Default bf16 compute path (half DMA bytes, bf16 MXU, f32 accumulate).
    out16 = jax.block_until_ready(calip_pf_block(Fs, Ft, Fv, **hparams))
    assert out16.shape == (B, 1, C), out16.shape
    assert jnp.allclose(out16, ref, atol=1e-1, rtol=5e-2), (
        f"bf16 max abs err {jnp.max(jnp.abs(out16 - ref))}")

    # 3) Distinct alphas -> separate-softmax branch (with class-padding mask).
    hp2 = dict(alpha_t=0.7, alpha_s=0.4, beta_1=1.0, beta_2=0.5, beta_3=0.5)
    ref2 = _reference(Fs, Ft, Fv, **hp2)
    out2 = jax.block_until_ready(
        calip_pf_block(Fs, Ft, Fv, compute_dtype=jnp.float32, **hp2))
    assert jnp.allclose(out2, ref2, atol=2e-2, rtol=2e-2), (
        f"distinct-alpha max abs err {jnp.max(jnp.abs(out2 - ref2))}")

    # 4) Batch that does not divide block_b -> edge-padded batch path.
    B3 = 3
    k4, k5 = jax.random.split(jax.random.PRNGKey(1), 2)
    Fs3 = jax.random.normal(k4, (B3, M, D), dtype=jnp.float32)
    Fv3 = jax.random.normal(k5, (B3, D), dtype=jnp.float32)
    Fv3 = Fv3 / jnp.linalg.norm(Fv3, axis=-1, keepdims=True)
    ref3 = _reference(Fs3, Ft, Fv3, **hparams)
    out3 = jax.block_until_ready(
        calip_pf_block(Fs3, Ft, Fv3, compute_dtype=jnp.float32, block_b=2,
                       **hparams))
    assert out3.shape == (B3, 1, C), out3.shape
    assert jnp.allclose(out3, ref3, atol=2e-2, rtol=2e-2), (
        f"padded-batch max abs err {jnp.max(jnp.abs(out3 - ref3))}")

    print("KERNEL_OK")
</pallas_src>

<mosaic_0001>
module attributes {stable_mosaic.version = 11 : i64} {
  func.func @_calip_kernel(%arg0: i32, %arg1: memref<2x16x32xf32, #tpu.memory_space<vmem>>, %arg2: memref<128x32xf32, #tpu.memory_space<vmem>>, %arg3: memref<32x128xf32, #tpu.memory_space<vmem>>, %arg4: memref<2x1x32xf32, #tpu.memory_space<vmem>>, %arg5: memref<2x1x128xf32, #tpu.memory_space<vmem>>) attributes {dimension_semantics = [#tpu.dimension_semantics<parallel>], iteration_bounds = array<i64: 1>, scalar_prefetch = 0 : i64, scratch_operands = 0 : i64, tpu.core_type = #tpu.core_type<tc>, window_params = [{transform_indices = @transform_0, window_bounds = array<i64: 2, 16, 32>}, {pipeline_mode = #tpu.pipeline_mode<synchronous>, transform_indices = @transform_1, window_bounds = array<i64: 128, 32>}, {pipeline_mode = #tpu.pipeline_mode<synchronous>, transform_indices = @transform_2, window_bounds = array<i64: 32, 128>}, {transform_indices = @transform_3, window_bounds = array<i64: 2, 1, 32>}, {transform_indices = @transform_4, window_bounds = array<i64: 2, 1, 128>}]} {
    %c0 = arith.constant 0 : index
    %c0_0 = arith.constant 0 : index
    %0 = vector.load %arg2[%c0, %c0_0] : memref<128x32xf32, #tpu.memory_space<vmem>>, vector<128x32xf32>
    %c0_1 = arith.constant 0 : index
    %c0_2 = arith.constant 0 : index
    %1 = vector.load %arg3[%c0_1, %c0_2] : memref<32x128xf32, #tpu.memory_space<vmem>>, vector<32x128xf32>
    %c0_3 = arith.constant 0 : index
    %c0_4 = arith.constant 0 : index
    %c0_5 = arith.constant 0 : index
    %2 = vector.load %arg4[%c0_3, %c0_4, %c0_5] : memref<2x1x32xf32, #tpu.memory_space<vmem>>, vector<2x1x32xf32>
    %c0_6 = arith.constant 0 : index
    %c0_7 = arith.constant 0 : index
    %c0_8 = arith.constant 0 : index
    %3 = vector.load %arg1[%c0_6, %c0_7, %c0_8] : memref<2x16x32xf32, #tpu.memory_space<vmem>>, vector<2x16x32xf32>
    %4 = arith.mulf %3, %3 : vector<2x16x32xf32>
    %cst = arith.constant dense<0.000000e+00> : vector<2x16xf32>
    %5 = vector.multi_reduction <add>, %4, %cst [2] : vector<2x16x32xf32> to vector<2x16xf32>
    %6 = vector.shape_cast %5 : vector<2x16xf32> to vector<2x16x1xf32>
    %7 = math.rsqrt %6 : vector<2x16x1xf32>
    %8 = vector.shape_cast %3 : vector<2x16x32xf32> to vector<32x32xf32>
    %cst_9 = arith.constant dense<0.000000e+00> : vector<32x128xf32>
    %9 = tpu.matmul %8, %1, %cst_9 {dimension_numbers = #tpu.dot_dimension_numbers<[1], [0], [0], [1], [0, 0, 1, 1], [], []>} : vector<32x32xf32>, vector<32x128xf32>, vector<32x128xf32> -> vector<32x128xf32>
    %10 = vector.shape_cast %9 : vector<32x128xf32> to vector<2x16x128xf32>
    %11 = vector.broadcast %7 : vector<2x16x1xf32> to vector<2x16x128xf32>
    %12 = arith.mulf %10, %11 : vector<2x16x128xf32>
    %13 = tpu.iota {dimensions = array<i32: 2>} : vector<1x1x128xi32>
    %c8_i32 = arith.constant 8 : i32
    %14 = vector.broadcast %c8_i32 : i32 to vector<1x1x128xi32>
    %15 = arith.cmpi slt, %13, %14 : vector<1x1x128xi32>
    %cst_10 = arith.constant 2.000000e+00 : f32
    %16 = vector.broadcast %cst_10 : f32 to vector<2x16x128xf32>
    %17 = arith.mulf %12, %16 : vector<2x16x128xf32>
    %cst_11 = arith.constant dense<0xFF800000> : vector<2x16xf32>
    %18 = vector.multi_reduction <maximumf>, %17, %cst_11 [2] : vector<2x16x128xf32> to vector<2x16xf32>
    %19 = vector.shape_cast %18 : vector<2x16xf32> to vector<2x16x1xf32>
    %cst_12 = arith.constant dense<0xFF800000> : vector<2x1xf32>
    %20 = vector.multi_reduction <maximumf>, %19, %cst_12 [1] : vector<2x16x1xf32> to vector<2x1xf32>
    %21 = vector.shape_cast %20 : vector<2x1xf32> to vector<2x1x1xf32>
    %22 = vector.broadcast %21 : vector<2x1x1xf32> to vector<2x16x128xf32>
    %23 = arith.subf %17, %22 : vector<2x16x128xf32>
    %24 = math.exp %23 : vector<2x16x128xf32>
    %cst_13 = arith.constant 0.000000e+00 : f32
    %25 = vector.shape_cast %15 : vector<1x1x128xi1> to vector<1x1x128xi1>
    %26 = vector.broadcast %25 : vector<1x1x128xi1> to vector<2x16x128xi1>
    %27 = vector.broadcast %cst_13 : f32 to vector<2x16x128xf32>
    %28 = arith.select %26, %24, %27 : vector<2x16x128xi1>, vector<2x16x128xf32>
    %cst_14 = arith.constant dense<0.000000e+00> : vector<2x16xf32>
    %29 = vector.multi_reduction <add>, %28, %cst_14 [2] : vector<2x16x128xf32> to vector<2x16xf32>
    %30 = vector.shape_cast %29 : vector<2x16xf32> to vector<2x16x1xf32>
    %cst_15 = arith.constant dense<0.000000e+00> : vector<2x128xf32>
    %31 = vector.multi_reduction <add>, %24, %cst_15 [1] : vector<2x16x128xf32> to vector<2x128xf32>
    %32 = vector.shape_cast %31 : vector<2x128xf32> to vector<2x1x128xf32>
    %33 = vector.broadcast %30 : vector<2x16x1xf32> to vector<2x16x128xf32>
    %34 = arith.divf %28, %33 : vector<2x16x128xf32>
    %35 = vector.broadcast %32 : vector<2x1x128xf32> to vector<2x16x128xf32>
    %36 = arith.divf %24, %35 : vector<2x16x128xf32>
    %37 = vector.shape_cast %34 : vector<2x16x128xf32> to vector<32x128xf32>
    %cst_16 = arith.constant dense<0.000000e+00> : vector<32x32xf32>
    %38 = tpu.matmul %37, %0, %cst_16 {dimension_numbers = #tpu.dot_dimension_numbers<[1], [0], [0], [1], [0, 0, 1, 1], [], []>} : vector<32x128xf32>, vector<128x32xf32>, vector<32x32xf32> -> vector<32x32xf32>
    %39 = vector.shape_cast %38 : vector<32x32xf32> to vector<2x16x32xf32>
    %cst_17 = arith.constant dense<0.000000e+00> : vector<2x32xf32>
    %40 = vector.multi_reduction <add>, %39, %cst_17 [1] : vector<2x16x32xf32> to vector<2x32xf32>
    %cst_18 = arith.constant 1.600000e+01 : f32
    %41 = vector.broadcast %cst_18 : f32 to vector<2x32xf32>
    %42 = arith.divf %40, %41 : vector<2x32xf32>
    %cst_19 = arith.constant dense<0xFF800000> : vector<2x32xf32>
    %43 = vector.multi_reduction <maximumf>, %39, %cst_19 [1] : vector<2x16x32xf32> to vector<2x32xf32>
    %44 = arith.addf %42, %43 : vector<2x32xf32>
    %45 = vector.broadcast %2 : vector<2x1x32xf32> to vector<2x16x32xf32>
    %46 = arith.mulf %45, %3 : vector<2x16x32xf32>
    %cst_20 = arith.constant dense<0.000000e+00> : vector<2x16xf32>
    %47 = vector.multi_reduction <add>, %46, %cst_20 [2] : vector<2x16x32xf32> to vector<2x16xf32>
    %48 = vector.shape_cast %7 : vector<2x16x1xf32> to vector<2x16xf32>
    %49 = arith.mulf %47, %48 : vector<2x16xf32>
    %50 = vector.shape_cast %49 : vector<2x16xf32> to vector<2x16x1xf32>
    %51 = vector.broadcast %50 : vector<2x16x1xf32> to vector<2x16x128xf32>
    %52 = arith.mulf %51, %36 : vector<2x16x128xf32>
    %cst_21 = arith.constant dense<0.000000e+00> : vector<2x128xf32>
    %53 = vector.multi_reduction <add>, %52, %cst_21 [1] : vector<2x16x128xf32> to vector<2x128xf32>
    %54 = vector.shape_cast %53 : vector<2x128xf32> to vector<2x1x128xf32>
    %cst_22 = arith.constant 1.000000e+00 : f32
    %55 = vector.broadcast %cst_22 : f32 to vector<2x1x32xf32>
    %56 = arith.mulf %55, %2 : vector<2x1x32xf32>
    %57 = vector.shape_cast %44 : vector<2x32xf32> to vector<2x1x32xf32>
    %cst_23 = arith.constant 5.000000e-01 : f32
    %58 = vector.broadcast %cst_23 : f32 to vector<2x1x32xf32>
    %59 = arith.mulf %58, %57 : vector<2x1x32xf32>
    %60 = arith.addf %56, %59 : vector<2x1x32xf32>
    %61 = vector.shape_cast %60 : vector<2x1x32xf32> to vector<2x32xf32>
    %cst_24 = arith.constant dense<0.000000e+00> : vector<2x128xf32>
    %62 = tpu.matmul %61, %1, %cst_24 {dimension_numbers = #tpu.dot_dimension_numbers<[1], [0], [0], [1], [0, 0, 1, 1], [], []>} : vector<2x32xf32>, vector<32x128xf32>, vector<2x128xf32> -> vector<2x128xf32>
    %63 = vector.shape_cast %62 : vector<2x128xf32> to vector<2x1x128xf32>
    %cst_25 = arith.constant 5.000000e-01 : f32
    %64 = vector.broadcast %cst_25 : f32 to vector<2x1x128xf32>
    %65 = arith.mulf %64, %54 : vector<2x1x128xf32>
    %66 = arith.addf %63, %65 : vector<2x1x128xf32>
    %cst_26 = arith.constant 14.2857141 : f32
    %67 = vector.broadcast %cst_26 : f32 to vector<2x1x128xf32>
    %68 = arith.mulf %67, %66 : vector<2x1x128xf32>
    %c0_27 = arith.constant 0 : index
    %c0_28 = arith.constant 0 : index
    %c0_29 = arith.constant 0 : index
    %69 = vector.load %arg5[%c0_27, %c0_28, %c0_29] : memref<2x1x128xf32, #tpu.memory_space<vmem>>, vector<2x1x128xf32>
    tpu.vector_store %arg5[%c0_27, %c0_28, %c0_29], %68 {strides = array<i32>} : memref<2x1x128xf32, #tpu.memory_space<vmem>>, vector<2x1x128xf32>,
    return
  }
  func.func @transform_0(%arg0: i32) -> (i32, i32, i32) {
    %c0_i32 = arith.constant 0 : i32
    %c0_i32_0 = arith.constant 0 : i32
    %c0_i32_1 = arith.constant 0 : i32
    return %arg0, %c0_i32, %c0_i32_0 : i32, i32, i32
  }
  func.func @transform_1(%arg0: i32) -> (i32, i32) {
    %c0_i32 = arith.constant 0 : i32
    %c0_i32_0 = arith.constant 0 : i32
    %c0_i32_1 = arith.constant 0 : i32
    return %c0_i32, %c0_i32_0 : i32, i32
  }
  func.func @transform_2(%arg0: i32) -> (i32, i32) {
    %c0_i32 = arith.constant 0 : i32
    %c0_i32_0 = arith.constant 0 : i32
    %c0_i32_1 = arith.constant 0 : i32
    return %c0_i32, %c0_i32_0 : i32, i32
  }
  func.func @transform_3(%arg0: i32) -> (i32, i32, i32) {
    %c0_i32 = arith.constant 0 : i32
    %c0_i32_0 = arith.constant 0 : i32
    %c0_i32_1 = arith.constant 0 : i32
    return %arg0, %c0_i32, %c0_i32_0 : i32, i32, i32
  }
  func.func @transform_4(%arg0: i32) -> (i32, i32, i32) {
    %c0_i32 = arith.constant 0 : i32
    %c0_i32_0 = arith.constant 0 : i32
    %c0_i32_1 = arith.constant 0 : i32
    return %arg0, %c0_i32, %c0_i32_0 : i32, i32, i32
  }
}

</mosaic_0001>

<bundles_post_ra>
// kernel: tpu_custom_call.1
= control target key start
LH: loop header
LB: loop body
LE: loop exit
PB: predicated region body
PF: predicated region fallthrough
CT: control target
= control target key end

     0   :  { %9 = vsyncpa [#allocation3], 0  ;;  %s1169_s0 = inlined_call_operand.hbm [shape: f32[2,16,32], index: 0, kind: input, shape index: {}]   ;;  %s1170_s1 = inlined_call_operand.hbm [shape: f32[128,32], index: 1, kind: input, shape index: {}]   ;;  %s1171_s2 = inlined_call_operand.hbm [shape: f32[32,128], index: 2, kind: input, shape index: {}]   ;;  %s1172_s3 = inlined_call_operand.hbm [shape: f32[2,1,32], index: 3, kind: input, shape index: {}]   ;;  %s1173_s4 = inlined_call_operand.hbm [shape: f32[2,1,128], index: 4, kind: output, shape index: {}]  }
   0x1   :  { %10 = vsyncpa [#allocation6], 0 }
   0x2   :  { %11 = vsyncpa [#allocation9], 0 }
   0x3   :  { %12 = vsyncpa [#allocation4], 0  ;;  %s931_s15 = smov [#allocation5]   ;;  %s932_s17 = smov [#allocation2]  }
   0x4   :  { %s30_s16 = sshll.u32 %s931_s15, 4  ;;  %s18_s18 = sshll.u32 %s932_s17, 4  ;;  %s31_s16 = int_to_ptr.vmem [resolvable:$true] %s30_s16  ;;  %s969_s18 = int_to_ptr.vmem [resolvable:$true] %s18_s18 }
   0x5   :  { %s813_s21 = scalar_lea.hbm %s1170_s1, 2048 }
   0x6   :  { %p814_p0 = scmp.ne.s32.totalorder %s1170_s1, %s813_s21  ;;  %p817_p1 = scmp.lt.u32.totalorder %s813_s21, %s1170_s1 }
   0x8   :  { %p819_p2 = pnand %p817_p1, %p814_p0 }
   0xa   :  { %822 = shalt.err (!%p819_p2)
}
   0xb   :  { %s823_s26 = scalar_lea.vmem %s31_s16, 2048  ;;  %p828_p4 = scmp.lt.s32.totalorder %s31_s16, %s31_s16 }
   0xc   :  { %p824_p3 = scmp.ne.s32.totalorder %s31_s16, %s823_s26  ;;  %p829_p5 = scmp.lt.s32.totalorder %s823_s26, %s823_s26 }
   0xe   :  { %p830_p6 = por %p829_p5, %p828_p4 }
  0x10   :  { %p831_p7 = pnand %p830_p6, %p824_p3 }
  0x12   :  { %834 = shalt.err (!%p831_p7)
}
  0x13   :  { %s933_s27 = smov 128   ;;  %s934_s28 = smov 8  }
  0x14   :  { %36 = dma.hbm_to_vmem [thread:$0]  %s1170_s1, 2048, %s31_s16, [#allocation6], %s933_s27, %s933_s27, %s934_s28  }
  0x15   :  { %s835_s7 = scalar_lea.hbm %s1169_s0, 512 }
  0x16   :  { %p836_p8 = scmp.ne.s32.totalorder %s1169_s0, %s835_s7  ;;  %p839_p9 = scmp.lt.u32.totalorder %s835_s7, %s1169_s0 }
  0x18   :  { %p841_p10 = pnand %p839_p9, %p836_p8 }
  0x1a   :  { %844 = shalt.err (!%p841_p10)
}
  0x1b   :  { %s845_s12 = scalar_lea.vmem %s969_s18, 512  ;;  %p850_p12 = scmp.lt.s32.totalorder %s969_s18, %s969_s18 }
  0x1c   :  { %p846_p11 = scmp.ne.s32.totalorder %s969_s18, %s845_s12  ;;  %p851_p13 = scmp.lt.s32.totalorder %s845_s12, %s845_s12 }
  0x1e   :  { %p852_p0 = por %p851_p13, %p850_p12 }
  0x20   :  { %p853_p1 = pnand %p852_p0, %p846_p11 }
  0x22   :  { %856 = shalt.err (!%p853_p1)
}
  0x23   :  { %24 = dma.hbm_to_vmem [thread:$0]  %s1169_s0, 512, %s969_s18, [#allocation3], %s933_s27, %s933_s27, %s934_s28  }
  0x24   :  { %s935_s14 = smov [#allocation7]   ;;  %s936_s16 = smov [#allocation8]  }
  0x25   :  { %s42_s15 = sshll.u32 %s935_s14, 4  ;;  %s54_s17 = sshll.u32 %s936_s16, 4  ;;  %s43_s15 = int_to_ptr.vmem [resolvable:$true] %s42_s15  ;;  %s1006_s17 = int_to_ptr.vmem [resolvable:$true] %s54_s17 }
  0x26   :  { %s857_s21 = scalar_lea.hbm %s1171_s2, 512 }
  0x27   :  { %p858_p2 = scmp.ne.s32.totalorder %s1171_s2, %s857_s21  ;;  %p861_p3 = scmp.lt.u32.totalorder %s857_s21, %s1171_s2 }
  0x29   :  { %p863_p4 = pnand %p861_p3, %p858_p2 }
  0x2b   :  { %866 = shalt.err (!%p863_p4)
}
  0x2c   :  { %s867_s0 = scalar_lea.vmem %s43_s15, 512  ;;  %p872_p6 = scmp.lt.s32.totalorder %s43_s15, %s43_s15 }
  0x2d   :  { %p868_p5 = scmp.ne.s32.totalorder %s43_s15, %s867_s0  ;;  %p873_p7 = scmp.lt.s32.totalorder %s867_s0, %s867_s0 }
  0x2f   :  { %p874_p8 = por %p873_p7, %p872_p6 }
  0x31   :  { %p875_p9 = pnand %p874_p8, %p868_p5 }
  0x33   :  { %878 = shalt.err (!%p875_p9)
}
  0x34   :  { %48 = dma.hbm_to_vmem [thread:$0]  %s1171_s2, 512, %s43_s15, [#allocation6], %s933_s27, %s933_s27, %s934_s28  }
  0x35   :  { %s879_s5 = scalar_lea.hbm %s1172_s3, 32 }
  0x36   :  { %p880_p10 = scmp.ne.s32.totalorder %s1172_s3, %s879_s5  ;;  %p883_p11 = scmp.lt.u32.totalorder %s879_s5, %s1172_s3 }
  0x38   :  { %p885_p12 = pnand %p883_p11, %p880_p10 }
  0x3a   :  { %888 = shalt.err (!%p885_p12)
}
  0x3b   :  { %s889_s10 = scalar_lea.vmem %s1006_s17, 32  ;;  %p894_p0 = scmp.lt.s32.totalorder %s1006_s17, %s1006_s17 }
  0x3c   :  { %p890_p13 = scmp.ne.s32.totalorder %s1006_s17, %s889_s10  ;;  %p895_p1 = scmp.lt.s32.totalorder %s889_s10, %s889_s10 }
  0x3e   :  { %p896_p2 = por %p895_p1, %p894_p0 }
  0x40   :  { %p897_p3 = pnand %p896_p2, %p890_p13 }
  0x42   :  { %900 = shalt.err (!%p897_p3)
}
  0x43   :  { %s937_s2 = smov 16   ;;  %s938_s27 = smov 1  }
  0x44   :  { %60 = dma.hbm_to_vmem [thread:$0]  %s1172_s3, 32, %s1006_s17, [#allocation9], %s937_s2, %s937_s2, %s938_s27  }
  0x45   :  { %923 = dma.done.wait [#allocation3], 512  }
  0x46   :  { %924 = vsyncadd [#allocation3], 4294966784 }
  0x47   :  { %925 = dma.done.wait [#allocation6], 2560  }
  0x48   :  { %926 = vsyncadd [#allocation6], 4294964736 }
  0x49   :  { %927 = dma.done.wait [#allocation9], 32  }
  0x4a   :  { %928 = vsyncadd [#allocation9], 4294967264  ;;  %vm103_vm0 = vcmask 261120   ;;  %v89_v0 = vld [vmem:[#allocation7] sm:$0xff]  ;;  %v90_v1 = vld [vmem:[#allocation7 + $0x8] sm:$0xff]  ;;  %vm940_vm2 = vmmov 0  }
  0x4b   :  { %v91_v2 = vld [vmem:[#allocation7 + $0x10] sm:$0xff]  ;;  %v1043_v3 = vpack.c.bf16 %v90_v1, %v89_v0  ;;  %v92_v4 = vld [vmem:[#allocation7 + $0x18] sm:$0xff]  ;;  %v1045_v5 = vld [vmem:[#allocation2] sm:$0xff]  ;;  %s943_s3 = smov [#allocation10]  }
  0x4c   :  { %v1047_v6 = vld [vmem:[#allocation2 + $0x8] sm:$0xff]  ;;  %v1049_v7 = vpack.c.bf16 %v92_v4, %v91_v2  ;;  %671 = vmatprep.mubr.msk.f32.mxu0 %vm103_vm0, %v1045_v5  ;;  %v1053_v8 = vld [vmem:[#allocation2 + $0x10] sm:$0xff]  ;;  %v1055_v9 = vld [vmem:[#allocation2 + $0x18] sm:$0xff]  ;;  %v99_v10 = vmul.f32 %v1045_v5, %v1045_v5  ;;  %s611_s12 = sshll.u32 %s943_s3, 4  ;;  %s612_s12 = int_to_ptr.vmem [resolvable:$true] %s611_s12 }
  0x4d   :  { %v100_v11 = vmul.f32 %v1047_v6, %v1047_v6  ;;  %727 = vmatprep.subr.bf16.mxu0 %v1043_v3  ;;  %v101_v12 = vmul.f32 %v1053_v8, %v1053_v8  ;;  %v102_v13 = vmul.f32 %v1055_v9, %v1055_v9  ;;  %v73_v38 = vld [vmem:[#allocation5] sm:$0xff]  ;;  %v74_v39 = vld [vmem:[#allocation5 + $0x8] sm:$0xff]  ;;  %v75_v40 = vld [vmem:[#allocation5 + $0x10] sm:$0xff]  ;;  %s901_s1 = scalar_lea.vmem %s612_s12, 32  ;;  %p906_p5 = scmp.lt.s32.totalorder %s612_s12, %s612_s12 }
  0x4e   :  { %729 = vmatpush3.bf16.msra.mxu0 %v1043_v3  ;;  %v104_v14 = vsel %vm103_vm0, %v99_v10, 0.0  ;;  %v734_v41 = vpack.c.bf16 %v74_v39, %v73_v38  ;;  %v76_v42 = vld [vmem:[#allocation5 + $0x18] sm:$0xff]  ;;  %v77_v44 = vld [vmem:[#allocation5 + $0x20] sm:$0xff]  ;;  %v78_v45 = vld [vmem:[#allocation5 + $0x28] sm:$0xff]  ;;  %p902_p4 = scmp.ne.s32.totalorder %s612_s12, %s901_s1  ;;  %p907_p6 = scmp.lt.s32.totalorder %s901_s1, %s901_s1 }
  0x4f   :  { %731 = vmatprep.subr.bf16.mxu0 %v1049_v7  ;;  %105 = vadd.xlane.f32.xlu0 %v104_v14  ;;  %v110_v15 = vsel %vm103_vm0, %v101_v12, 0.0  ;;  %v107_v16 = vsel %vm103_vm0, %v100_v11, 0.0  ;;  %v113_v17 = vsel %vm103_vm0, %v102_v13, 0.0  ;;  %v738_v43 = vpack.c.bf16 %v76_v42, %v75_v40  ;;  %v79_v47 = vld [vmem:[#allocation5 + $0x30] sm:$0xff]  ;;  %v80_v48 = vld [vmem:[#allocation5 + $0x38] sm:$0xff]  ;;  %v81_v50 = vld [vmem:[#allocation5 + $0x40] sm:$0xff] }
  0x50   :  { %111 = vadd.xlane.f32.xlu1 %v110_v15  ;;  %735 = vmatprep.subr.bf16.mxu1 %v734_v41  ;;  %v742_v46 = vpack.c.bf16 %v78_v45, %v77_v44  ;;  %v746_v49 = vpack.c.bf16 %v80_v48, %v79_v47  ;;  %v82_v51 = vld [vmem:[#allocation5 + $0x48] sm:$0xff]  ;;  %p908_p7 = por %p907_p6, %p906_p5 }
  0x51   :  { %737 = vmatpush3.bf16.msra.mxu1 %v734_v41  ;;  %v750_v52 = vpack.c.bf16 %v82_v51, %v81_v50 }
  0x52   :  { %733 = vmatpush3.bf16.msra.mxu0 %v1049_v7  ;;  %739 = vmatprep.subr.bf16.mxu1 %v738_v43  ;;  %p909_p8 = pnand %p908_p7, %p902_p4 }
  0x53   :  { %108 = vadd.xlane.f32.xlu0 %v107_v16 }
  0x54   :  { %114 = vadd.xlane.f32.xlu1 %v113_v17  ;;  %v221_v17 = vlaneseq }
  0x55   :  { %672 = vmatmul.mubr.msk.f32.vlgmr.msra.gmra.mrb[0].mxu0 %vm103_vm0, %v1047_v6  ;;  %741 = vmatpush3.bf16.msra.mxu1 %v738_v43 }
  0x56   :  { %674 = vmatprep.mubr.msk.f32.mxu0 %vm103_vm0, %v1053_v8  ;;  %743 = vmatprep.subr.bf16.mxu1 %v742_v46 }
  0x59   :  { %675 = vmatmul.mubr.msk.f32.gmra.mrb[2].mxu0 %vm103_vm0, %v1055_v9  ;;  %745 = vmatpush3.bf16.msra.mxu1 %v742_v46 }
  0x5a   :  { %747 = vmatprep.subr.bf16.mxu1 %v746_v49 }
  0x5d   :  { %749 = vmatpush3.bf16.msra.mxu1 %v746_v49 }
  0x5e   :  { %751 = vmatprep.subr.bf16.mxu1 %v750_v52 }
  0x61   :  { %753 = vmatpush3.bf16.msra.mxu1 %v750_v52 }
  0xdc   :  { %v106_v18 = vpop.xlane.xlu0 %105 }
  0xdd   :  { %v112_v19 = vpop.xlane.xlu1 %111 }
  0xe0   :  { %v109_v20 = vpop.xlane.xlu0 %108 }
  0xe1   :  { %785 = vrsqrt.f32 %v109_v20  ;;  %v115_v21 = vpop.xlane.xlu1 %114  ;;  %v1091_v20 = vshrl.u32 %v221_v17, 7 }
  0xe2   :  { %787 = vrsqrt.f32 %v106_v18 }
  0xe3   :  { %789 = vrsqrt.f32 %v115_v21 }
  0xe4   :  { %791 = vrsqrt.f32 %v112_v19 }
  0xeb   :  { %v1079_v22 = vpop.eup %785 }
  0xec   :  { %v1081_v24 = vpop.eup %787 }
  0xed   :  { %v1084_v27 = vpop.eup %789 }
  0xee   :  { %v1087_v32 = vpop.eup %791 }
 0x128   :  { %v673_v23 = vpop.f32.mrb[0].mxu0 }
 0x129   :  { %v218_v25 = vmul.f32 %v1079_v22, %v673_v23  ;;  %v198_v26 = vpop.f32.mrb[1].mxu0 }
 0x12a   :  { %v217_v28 = vmul.f32 %v1081_v24, %v198_v26  ;;  %v434_v26 = vsub.s32 0, %v1091_v20 }
 0x12b   :  { %v225_v29 = vmul.f32 2.0, %v218_v25  ;;  %v222_v25 = vand.u32 127, %v221_v17 }
 0x12c   :  { %v224_v30 = vmul.f32 2.0, %v217_v28  ;;  %v676_v31 = vpop.f32.mrb[2].mxu0  ;;  %v1094_v28 = vld [vmem:[#allocation8] sm:$0x1] }
 0x12d   :  { %v220_v33 = vmul.f32 %v1084_v27, %v676_v31  ;;  %230 = vmax.xlane.f32.xlu1 %v225_v29  ;;  %v208_v34 = vpop.f32.mrb[3].mxu0  ;;  %vm223_vm1 = vcmp.lt.s32.totalorder %v222_v25, 8  ;;  %v1097_v31 = vld [vmem:[#allocation8 + $0x1] sm:$0x1] }
 0x12e   :  { %v219_v35 = vmul.f32 %v1087_v32, %v208_v34  ;;  %228 = vmax.xlane.f32.xlu0 %v224_v30  ;;  %v439_v38 = vrot.slane %v1097_v31, %v434_v26 }
 0x12f   :  { %v227_v36 = vmul.f32 2.0, %v220_v33 }
 0x130   :  { %v226_v37 = vmul.f32 2.0, %v219_v35  ;;  %v444_v47 = vmul.f32 %v439_v38, %v1053_v8  ;;  %v445_v48 = vmul.f32 %v439_v38, %v1055_v9  ;;  %v83_v8 = vld [vmem:[#allocation5 + $0x50] sm:$0xff] }
 0x131   :  { %234 = vmax.xlane.f32.xlu1 %v227_v36 }
 0x132   :  { %232 = vmax.xlane.f32.xlu0 %v226_v37 }
 0x1ba   :  { %v231_v53 = vpop.xlane.xlu1 %230 }
 0x1bb   :  { %v229_v54 = vpop.xlane.xlu0 %228 }
 0x1bc   :  { %v236_v55 = vmax.f32 %v229_v54, %v231_v53  ;;  %v452_v53 = vsel %vm103_vm0, %v444_v47, 0.0  ;;  %v455_v54 = vsel %vm103_vm0, %v445_v48, 0.0 }
 0x1be   :  { %v237_v56 = vrot.slane %v236_v55, 4  ;;  %v235_v57 = vpop.xlane.xlu1 %234 }
 0x1bf   :  { %v233_v58 = vpop.xlane.xlu0 %232 }
 0x1c0   :  { %v238_v59 = vmax.f32 %v236_v55, %v237_v56  ;;  %v243_v60 = vmax.f32 %v233_v58, %v235_v57 }
 0x1c2   :  { %v239_v61 = vrot.slane %v238_v59, 2  ;;  %v244_v62 = vrot.slane %v243_v60, 4 }
 0x1c4   :  { %v240_v63 = vmax.f32 %v238_v59, %v239_v61  ;;  %v245_v0 = vmax.f32 %v243_v60, %v244_v62  ;;  %v84_v59 = vld [vmem:[#allocation5 + $0x58] sm:$0xff]  ;;  %v85_v62 = vld [vmem:[#allocation5 + $0x60] sm:$0xff] }
 0x1c5   :  { %v754_v60 = vpack.c.bf16 %v84_v59, %v83_v8 }
 0x1c6   :  { %v241_v1 = vrot.slane %v240_v63, 1  ;;  %v246_v2 = vrot.slane %v245_v0, 2 }
 0x1c7   :  { %755 = vmatprep.subr.bf16.mxu1 %v754_v60 }
 0x1c8   :  { %v242_v4 = vmax.f32 %v240_v63, %v241_v1  ;;  %v247_v10 = vmax.f32 %v245_v0, %v246_v2  ;;  %757 = vmatpush3.bf16.msra.mxu1 %v754_v60  ;;  %v86_v63 = vld [vmem:[#allocation5 + $0x68] sm:$0xff]  ;;  %v87_v1 = vld [vmem:[#allocation5 + $0x70] sm:$0xff]  ;;  %v88_v2 = vld [vmem:[#allocation5 + $0x78] sm:$0xff] }
 0x1c9   :  { %v758_v0 = vpack.c.bf16 %v86_v63, %v85_v62 }
 0x1ca   :  { %v250_v11 = vsub.f32 %v224_v30, %v242_v4  ;;  %v251_v12 = vsub.f32 %v225_v29, %v242_v4  ;;  %v248_v13 = vrot.slane %v247_v10, 1  ;;  %v435_v29 = vrot.slane %v1094_v28, %v434_v26 }
 0x1cb   :  { %759 = vmatprep.subr.bf16.mxu1 %v758_v0  ;;  %v762_v4 = vpack.c.bf16 %v88_v2, %v87_v1 }
 0x1cc   :  { %v254_v14 = vmul.f32 1.442695, %v250_v11  ;;  %v256_v15 = vmul.f32 1.442695, %v251_v12  ;;  %v249_v16 = vmax.f32 %v247_v10, %v248_v13  ;;  %v443_v40 = vmul.f32 %v435_v29, %v1047_v6  ;;  %761 = vmatpush3.bf16.msra.mxu1 %v758_v0 }
 0x1cd   :  { %763 = vmatprep.subr.bf16.mxu1 %v762_v4 }
 0x1ce   :  { %793 = vpow2.f32 %v254_v14  ;;  %v252_v18 = vsub.f32 %v226_v37, %v249_v16  ;;  %v253_v19 = vsub.f32 %v227_v36, %v249_v16  ;;  %v442_v37 = vmul.f32 %v435_v29, %v1045_v5 }
 0x1cf   :  { %795 = vpow2.f32 %v256_v15  ;;  %v449_v6 = vsel %vm103_vm0, %v443_v40, 0.0 }
 0x1d0   :  { %v258_v21 = vmul.f32 1.442695, %v252_v18  ;;  %v260_v23 = vmul.f32 1.442695, %v253_v19  ;;  %v446_v5 = vsel %vm103_vm0, %v442_v37, 0.0  ;;  %765 = vmatpush3.bf16.msra.mxu1 %v762_v4 }
 0x1d2   :  { %797 = vpow2.f32 %v258_v21 }
 0x1d3   :  { %799 = vpow2.f32 %v260_v23 }
 0x1d8   :  { %v794_v30 = vpop.eup %793 }
 0x1d9   :  { %v796_v33 = vpop.eup %795  ;;  %v1100_v34 = vsel %vm223_vm1, %v794_v30, 0.0 }
 0x1da   :  { %v1103_v35 = vsel %vm223_vm1, %v796_v33, 0.0  ;;  %268 = vadd.xlane.f32.xlu0 %v1100_v34  ;;  %v276_v36 = vadd.f32 %v796_v33, %v794_v30 }
 0x1db   :  { %270 = vadd.xlane.f32.xlu1 %v1103_v35 }
 0x1dc   :  { %v798_v39 = vpop.eup %797  ;;  %v277_v41 = vrot.slane %v276_v36, 4 }
 0x1dd   :  { %v800_v42 = vpop.eup %799  ;;  %v1111_v43 = vsel %vm223_vm1, %v798_v39, 0.0 }
 0x1de   :  { %v1114_v44 = vsel %vm223_vm1, %v800_v42, 0.0  ;;  %272 = vadd.xlane.f32.xlu0 %v1111_v43  ;;  %v278_v45 = vadd.f32 %v277_v41, %v276_v36  ;;  %v283_v46 = vadd.f32 %v800_v42, %v798_v39 }
 0x1df   :  { %274 = vadd.xlane.f32.xlu1 %v1114_v44 }
 0x1e0   :  { %v279_v49 = vrot.slane %v278_v45, 2  ;;  %v284_v50 = vrot.slane %v283_v46, 4 }
 0x1e2   :  { %447 = vadd.xlane.f32.xlu0 %v446_v5  ;;  %v280_v51 = vadd.f32 %v279_v49, %v278_v45  ;;  %v285_v52 = vadd.f32 %v284_v50, %v283_v46 }
 0x1e3   :  { %450 = vadd.xlane.f32.xlu1 %v449_v6 }
 0x1e4   :  { %v281_v55 = vrot.slane %v280_v51, 1  ;;  %v286_v56 = vrot.slane %v285_v52, 2 }
 0x1e6   :  { %453 = vadd.xlane.f32.xlu0 %v452_v53  ;;  %v282_v57 = vadd.f32 %v281_v55, %v280_v51  ;;  %v287_v58 = vadd.f32 %v286_v56, %v285_v52 }
 0x1e7   :  { %456 = vadd.xlane.f32.xlu1 %v455_v54 }
 0x1e8   :  { %801 = vrcp.f32 %v282_v57  ;;  %v288_v9 = vrot.slane %v287_v58, 1 }
 0x1ea   :  { %v289_v61 = vadd.f32 %v288_v9, %v287_v58 }
 0x1ec   :  { %803 = vrcp.f32 %v289_v61 }
 0x1f2   :  { %v802_v10 = vpop.eup %801 }
 0x1f3   :  { %v300_v11 = vmul.f32 %v802_v10, %v796_v33  ;;  %v299_v12 = vmul.f32 %v802_v10, %v794_v30 }
 0x1f6   :  { %v804_v13 = vpop.eup %803 }
 0x1f7   :  { %v303_v14 = vmul.f32 %v804_v13, %v800_v42  ;;  %v302_v15 = vmul.f32 %v804_v13, %v798_v39 }
 0x267   :  { %v269_v16 = vpop.xlane.xlu0 %268 }
 0x268   :  { %v271_v17 = vpop.xlane.xlu1 %270  ;;  %805 = vrcp.f32 %v269_v16 }
 0x269   :  { %807 = vrcp.f32 %v271_v17 }
 0x26b   :  { %v273_v18 = vpop.xlane.xlu0 %272 }
 0x26c   :  { %v275_v19 = vpop.xlane.xlu1 %274  ;;  %809 = vrcp.f32 %v273_v18 }
 0x26d   :  { %811 = vrcp.f32 %v275_v19 }
 0x26f   :  { %v448_v21 = vpop.xlane.xlu0 %447 }
 0x270   :  { %v451_v23 = vpop.xlane.xlu1 %450  ;;  %v458_v25 = vmul.f32 %v1081_v24, %v448_v21 }
 0x271   :  { %v459_v26 = vmul.f32 %v1079_v22, %v451_v23 }
 0x272   :  { %v806_v29 = vpop.eup %805  ;;  %v462_v30 = vmul.f32 %v458_v25, %v299_v12  ;;  %v942_v25 = vmov 1966171168  }
 0x273   :  { %v808_v33 = vpop.eup %807  ;;  %v463_v36 = vmul.f32 %v459_v26, %v300_v11  ;;  %v454_v37 = vpop.xlane.xlu0 %453  ;;  %v291_v38 = vmul.f32 %v806_v29, %v1100_v34  ;;  %v488_v26 = vunpack.c.l.s4 %v942_v25 }
 0x274   :  { %v457_v39 = vpop.xlane.xlu1 %456  ;;  %v460_v40 = vmul.f32 %v1087_v32, %v454_v37  ;;  %v293_v41 = vmul.f32 %v808_v33, %v1103_v35  ;;  %v939_v32 = vmov 0.0|0.0  }
 0x275   :  { %v1129_v42 = vadd.f32 %v463_v36, %v462_v30  ;;  %v461_v45 = vmul.f32 %v1084_v27, %v457_v39  ;;  %709 = vmatprep.mubr.f32.mxu1 %v291_v38  ;;  %766 = vmatprep.subr.bf16.mxu0 %v939_v32  ;;  %v941_v27 = vmov 0.0   ;;  %v489_v37 = vunpack.c.0.s8 %v488_v26 }
 0x276   :  { %v810_v24 = vpop.eup %809  ;;  %v464_v46 = vmul.f32 %v460_v40, %v302_v15  ;;  %710 = vmatmul.mubr.f32.vlgmr.msra.gmra.mrb[0].mxu1 %v293_v41  ;;  %768 = vmatpush3.bf16.msra.mxu0 %v1043_v3 }
 0x277   :  { %v812_v22 = vpop.eup %811  ;;  %v465_v5 = vmul.f32 %v461_v45, %v303_v14  ;;  %v295_v47 = vmul.f32 %v810_v24, %v1111_v43  ;;  %769 = vmatprep.subr.bf16.mxu0 %v939_v32  ;;  %723 = vmatprep.mubr.msk.f32.mxu0 %vm940_vm2, %v941_v27  ;;  %v492_v41 = vsub.s32 %v489_v37, %v1091_v20 }
 0x278   :  { %v297_v6 = vmul.f32 %v812_v22, %v1114_v44 }
 0x279   :  { %v1134_v34 = vadd.f32 %v465_v5, %v464_v46  ;;  %712 = vmatprep.mubr.f32.mxu1 %v295_v47  ;;  %v467_v47 = vrot.slane %v1129_v42, 4 }
 0x27a   :  { %713 = vmatmul.mubr.f32.gmra.mrb[2].mxu1 %v297_v6  ;;  %771 = vmatpush3.bf16.msra.mxu0 %v1049_v7 }
 0x27b   :  { %v474_v6 = vrot.slane %v1134_v34, 4  ;;  %v468_v32 = vadd.f32 %v467_v47, %v1129_v42 }
 0x27d   :  { %v475_v27 = vadd.f32 %v474_v6, %v1134_v34 }
 0x349   :  { %v711_v35 = vpop.f32.mrb[0].mxu1 }
 0x34a   :  { %v390_v48 = vsel %vm103_vm0, %v711_v35, 0.0  ;;  %v411_v43 = vsel %vm103_vm0, %v711_v35, -inf  ;;  %v370_v44 = vpop.f32.mrb[1].mxu1  ;;  %v469_v35 = vrot.slane %v468_v32, 2 }
 0x34b   :  { %v389_v49 = vsel %vm103_vm0, %v370_v44, 0.0  ;;  %v410_v50 = vsel %vm103_vm0, %v370_v44, -inf }
 0x34c   :  { %v391_v51 = vadd.f32 %v390_v48, %v389_v49  ;;  %v412_v52 = vmax.f32 %v410_v50, %v411_v43  ;;  %v476_v48 = vrot.slane %v475_v27, 2  ;;  %v470_v20 = vadd.f32 %v469_v35, %v468_v32 }
 0x34d   :  { %v714_v53 = vpop.f32.mrb[2].mxu1 }
 0x34e   :  { %v392_v3 = vrot.slane %v391_v51, 4  ;;  %v413_v54 = vrot.slane %v412_v52, 4  ;;  %v399_v55 = vsel %vm103_vm0, %v714_v53, 0.0  ;;  %v420_v56 = vsel %vm103_vm0, %v714_v53, -inf  ;;  %v380_v7 = vpop.f32.mrb[3].mxu1 }
 0x34f   :  { %v398_v57 = vsel %vm103_vm0, %v380_v7, 0.0  ;;  %v419_v58 = vsel %vm103_vm0, %v380_v7, -inf  ;;  %v477_v43 = vadd.f32 %v476_v48, %v475_v27 }
 0x350   :  { %v393_v8 = vadd.f32 %v392_v3, %v391_v51  ;;  %v414_v59 = vmax.f32 %v412_v52, %v413_v54  ;;  %v400_v9 = vadd.f32 %v399_v55, %v398_v57  ;;  %v421_v60 = vmax.f32 %v419_v58, %v420_v56 }
 0x351   :  { %v478_v44 = vrot.slane %v477_v43, 1 }
 0x352   :  { %v394_v61 = vrot.slane %v393_v8, 2  ;;  %v415_v62 = vrot.slane %v414_v59, 2  ;;  %v401_v63 = vrot.slane %v400_v9, 4  ;;  %v422_v0 = vrot.slane %v421_v60, 4 }
 0x353   :  { %v479_v52 = vadd.f32 %v478_v44, %v477_v43 }
 0x354   :  { %v395_v1 = vadd.f32 %v394_v61, %v393_v8  ;;  %v416_v2 = vmax.f32 %v414_v59, %v415_v62  ;;  %v402_v4 = vadd.f32 %v401_v63, %v400_v9  ;;  %v423_v10 = vmax.f32 %v421_v60, %v422_v0 }
 0x355   :  { %v599_v7 = vmul.f32 0.5, %v479_v52 }
 0x356   :  { %v396_v11 = vrot.slane %v395_v1, 1  ;;  %v417_v12 = vrot.slane %v416_v2, 1  ;;  %v403_v13 = vrot.slane %v402_v4, 2  ;;  %v424_v14 = vrot.slane %v423_v10, 2 }
 0x358   :  { %v397_v15 = vadd.f32 %v396_v11, %v395_v1  ;;  %v404_v16 = vadd.f32 %v403_v13, %v402_v4  ;;  %v425_v17 = vmax.f32 %v423_v10, %v424_v14  ;;  %v418_v19 = vmax.f32 %v416_v2, %v417_v12 }
 0x35a   :  { %v408_v18 = vmul.f32 0.0625, %v397_v15  ;;  %v405_v21 = vrot.slane %v404_v16, 1  ;;  %v426_v23 = vrot.slane %v425_v17, 1 }
 0x35c   :  { %v428_v29 = vadd.f32 %v418_v19, %v408_v18  ;;  %v406_v30 = vadd.f32 %v405_v21, %v404_v16  ;;  %v427_v36 = vmax.f32 %v425_v17, %v426_v23 }
 0x35e   :  { %v409_v33 = vmul.f32 0.0625, %v406_v30  ;;  %v480_v38 = vmul.f32 0.5, %v428_v29 }
 0x360   :  { %v429_v39 = vadd.f32 %v427_v36, %v409_v33  ;;  %v482_v45 = vadd.f32 %v480_v38, %v1094_v28  ;;  %v471_v28 = vrot.slane %v470_v20, 1 }
 0x362   :  { %v481_v40 = vmul.f32 0.5, %v429_v39 }
 0x364   :  { %v483_v24 = vadd.f32 %v481_v40, %v1097_v31  ;;  %v472_v31 = vadd.f32 %v471_v28, %v470_v20 }
 0x366   :  { %v486_v46 = vcombine.low %v482_v45, %v483_v24  ;;  %v598_v54 = vmul.f32 0.5, %v472_v31 }
 0x368   :  { %v493_v22 = vrot.slane %v486_v46, %v492_v41 }
 0x36a   :  { %v500_v5 = vrot.slane %v493_v22, %v492_v41 }
 0x36c   :  { %724 = vmatmul.mubr.msk.f32.vlgmr.msra.gmra.mrb[4].mxu0 %vm103_vm0, %v500_v5 }
 0x43f   :  { %v569_v49 = vpop.f32.mrb[4].mxu0 }
 0x440   :  { %v580_v50 = vrot.slane %v569_v49, %v492_v41  ;;  %v725_v51 = vpop.f32.mrb[5].mxu0 }
 0x442   :  { %v581_v53 = vcombine.high %v580_v50, %v580_v50  ;;  %v588_v3 = vrot.slane %v580_v50, %v492_v41 }
 0x444   :  { %v595_v55 = vrot.slane %v581_v53, %v492_v41  ;;  %v600_v56 = vadd.f32 %v598_v54, %v588_v3 }
 0x446   :  { %v602_v42 = vmul.f32 14.285714, %v600_v56  ;;  %v601_v34 = vadd.f32 %v599_v7, %v595_v55 }
 0x448   :  { %604 = vst [vmem:[#allocation10] sm:$0x1] %v602_v42  ;;  %v603_v57 = vmul.f32 14.285714, %v601_v34 }
 0x44a   :  { %605 = vst [vmem:[#allocation10 + $0x1] sm:$0x1] %v603_v57 }
 0x44b   :  { %912 = shalt.err (!%p909_p8)
}
 0x44c   :  { %s913_s15 = scalar_lea.hbm %s1173_s4, 32 }
 0x44d   :  { %p914_p9 = scmp.ne.s32.totalorder %s1173_s4, %s913_s15  ;;  %p917_p10 = scmp.lt.u32.totalorder %s913_s15, %s1173_s4 }
 0x44f   :  { %p919_p11 = pnand %p917_p10, %p914_p9 }
 0x451   :  { %922 = shalt.err (!%p919_p11)
}
 0x452   :  { %617 = dma.vmem_to_hbm [thread:$0]  %s612_s12, 32, %s1173_s4, [#allocation4], %s937_s2, %s937_s2, %s938_s27  }
 0x453   :  { %929 = dma.done.wait [#allocation4], 32  }
 0x454   :  { %930 = vsyncadd [#allocation4], 4294967264 }
 0x455   :  { %621 = vsyncpa [#allocation3], 1 }
 0x456   :  { %622 = vsyncpa [#allocation6], 1 }
 0x457   :  { %623 = vsyncpa [#allocation9], 1 }
 0x458   :  { %624 = vsyncpa [#allocation4], 1 }

</bundles_post_ra>
